<compile_context>
chip_gen: v7x
topology: tpu7x:2x2x1
jax: 0.10.0
libtpu: 0.0.40
codegen_flags: <defaults>
</compile_context>

<pallas_src>
import functools

import jax
import jax.numpy as jnp
from jax.experimental import pallas as pl
from jax.experimental.pallas import tpu as pltpu


def _round_up(a, b):
    return ((a + b - 1) // b) * b


def _make_mlp_kernel(num_layers):
    """Kernel body for an MLP with `num_layers` linear layers (batch in lanes)."""

    def kernel(x_ref, *refs):
        # refs = (w0_ref, ..., w_{L-1}_ref, o_ref); weights are (out, in) bf16.
        w_refs = refs[:num_layers]
        o_ref = refs[num_layers]

        h = x_ref[...]  # (d_in, tile_n) bf16, batch on the lane axis
        for li in range(num_layers):
            acc = jnp.dot(w_refs[li][...], h, preferred_element_type=jnp.float32)
            if li < num_layers - 1:  # ReLU after every layer except the last
                h = jnp.maximum(acc, 0.0).astype(jnp.bfloat16)
            else:
                h = acc  # final layer result stays f32
        o_ref[...] = h.astype(o_ref.dtype)

    return kernel


def prepare_weights(weights):
    """Hoisted, once-per-model weight prep: keep PyTorch (out, in) layout, cast to bf16."""
    return [jnp.asarray(w, jnp.bfloat16) for w in weights]


def _pick_tile(n, requested):
    """Lane-axis tile: multiple of 128, <= padded N, >= 2 grid steps when possible."""
    n128 = _round_up(n, 128)
    t = max(128, min(_round_up(requested, 128), n128))
    if pl.cdiv(n128, t) < 2 and t > 128:  # v7x has 2 TensorCores -> want >= 2 steps
        t = max(128, _round_up(pl.cdiv(n128, 2), 128))
    return t


@functools.partial(jax.jit, static_argnames=("tile_n",))
def mlp_forward(x, weights_bf16, *, tile_n=2048):
    """Pallas forward pass of _MLP.

    x:            (N, n_input_dims), any float dtype (matches PyTorch .float() cast).
    weights_bf16: list from prepare_weights(): PyTorch-layout (out_i, in_i), bf16.
    Returns (N, n_output_dims) float32.
    """
    n, d_in = x.shape
    num_layers = len(weights_bf16)
    d_out = weights_bf16[-1].shape[0]

    tile = _pick_tile(n, tile_n)
    n_pad = _round_up(n, tile)

    # Layout plumbing: put the batch dim on the lane (last) axis, bf16 for the MXU.
    xt = jnp.asarray(x, jnp.float32).astype(jnp.bfloat16).T  # (d_in, N)
    if n_pad != n:
        xt = jnp.pad(xt, ((0, 0), (0, n_pad - n)))

    kernel = _make_mlp_kernel(num_layers)

    grid = (n_pad // tile,)
    in_specs = [pl.BlockSpec((d_in, tile), lambda i: (0, i))]
    for w in weights_bf16:
        # Full (tiny) weight block, identical at every grid step -> stays resident.
        in_specs.append(pl.BlockSpec(w.shape, lambda i: (0, 0)))
    out_specs = pl.BlockSpec((d_out, tile), lambda i: (0, i))

    out_t = pl.pallas_call(
        kernel,
        out_shape=jax.ShapeDtypeStruct((d_out, n_pad), jnp.float32),
        grid_spec=pltpu.PrefetchScalarGridSpec(
            num_scalar_prefetch=0,
            grid=grid,
            in_specs=in_specs,
            out_specs=out_specs,
        ),
        compiler_params=pltpu.CompilerParams(
            dimension_semantics=("parallel",),
        ),
    )(xt, *weights_bf16)

    return out_t[:, :n].T  # (N, d_out), float32


# ----------------------------- init / references -----------------------------

def kaiming_uniform_relu(key, out_features, in_features):
    """Deterministic stand-in for torch.nn.init.kaiming_uniform_(nonlinearity='relu')."""
    gain = jnp.sqrt(2.0)
    std = gain / jnp.sqrt(jnp.float32(in_features))
    bound = jnp.sqrt(3.0) * std
    return jax.random.uniform(
        key, (out_features, in_features), jnp.float32, minval=-bound, maxval=bound
    )


def build_mlp_params(key, cfg):
    """Weights in PyTorch Linear layout: (out_features, in_features), no biases."""
    dims = (
        [cfg["n_input_dims"]]
        + [cfg["n_neurons"]] * cfg["n_hidden_layers"]
        + [cfg["n_output_dims"]]
    )
    weights = []
    for i in range(len(dims) - 1):
        key, sub = jax.random.split(key)
        weights.append(kaiming_uniform_relu(sub, dims[i + 1], dims[i]))
    return weights


def mlp_reference_f32(x, weights):
    """Plain-JAX f32 reference matching the PyTorch Sequential."""
    h = jnp.asarray(x, jnp.float32)
    for i, w in enumerate(weights):
        h = h @ w.T
        if i < len(weights) - 1:
            h = jnp.maximum(h, 0.0)
    return h


def mlp_reference_bf16(x, weights):
    """Mirrors the kernel's precision: bf16 operands, f32 accumulation, f32 ReLU."""
    h = jnp.asarray(x, jnp.float32).astype(jnp.bfloat16)
    for i, w in enumerate(weights):
        acc = jnp.dot(h, jnp.asarray(w, jnp.bfloat16).T,
                      preferred_element_type=jnp.float32)
        if i < len(weights) - 1:
            h = jnp.maximum(acc, 0.0).astype(jnp.bfloat16)
        else:
            h = acc
    return h


if __name__ == "__main__":
    cfg = {
        "n_input_dims": 16,
        "n_neurons": 32,
        "n_hidden_layers": 2,
        "n_output_dims": 8,
    }

    key = jax.random.PRNGKey(0)
    key, wkey, xkey = jax.random.split(key, 3)

    weights = build_mlp_params(wkey, cfg)        # f32, PyTorch (out, in) layout
    weights_bf16 = prepare_weights(weights)      # hoisted: cast once, reuse per call

    # Small query-point count; not a multiple of 128 so the padding path is exercised.
    N = 1000
    x = jax.random.normal(xkey, (N, cfg["n_input_dims"]), jnp.float32)

    out = mlp_forward(x, weights_bf16, tile_n=2048)
    out = jax.block_until_ready(out)

    assert out.shape == (N, cfg["n_output_dims"])
    assert out.dtype == jnp.float32
    assert bool(jnp.all(jnp.isfinite(out)))

    # Tight check against a reference that mirrors the kernel's bf16/f32 precision.
    ref_bf16 = mlp_reference_bf16(x, weights)
    assert jnp.allclose(out, ref_bf16, atol=2e-3, rtol=2e-3), "mismatch vs bf16 reference"

    # Looser sanity check against the pure-f32 PyTorch-equivalent reference.
    ref_f32 = mlp_reference_f32(x, weights)
    assert jnp.allclose(out, ref_f32, atol=1e-1, rtol=5e-2), "mismatch vs f32 reference"

    print("KERNEL_OK")
</pallas_src>

<mosaic_0001>
module attributes {stable_mosaic.version = 11 : i64} {
  func.func @kernel(%arg0: i32, %arg1: memref<16x512xbf16, #tpu.memory_space<vmem>>, %arg2: memref<32x16xbf16, #tpu.memory_space<vmem>>, %arg3: memref<32x32xbf16, #tpu.memory_space<vmem>>, %arg4: memref<8x32xbf16, #tpu.memory_space<vmem>>, %arg5: memref<8x512xf32, #tpu.memory_space<vmem>>) attributes {dimension_semantics = [#tpu.dimension_semantics<parallel>], iteration_bounds = array<i64: 2>, scalar_prefetch = 0 : i64, scratch_operands = 0 : i64, tpu.core_type = #tpu.core_type<tc>, window_params = [{transform_indices = @transform_0, window_bounds = array<i64: 16, 512>}, {pipeline_mode = #tpu.pipeline_mode<synchronous>, transform_indices = @transform_1, window_bounds = array<i64: 32, 16>}, {pipeline_mode = #tpu.pipeline_mode<synchronous>, transform_indices = @transform_2, window_bounds = array<i64: 32, 32>}, {pipeline_mode = #tpu.pipeline_mode<synchronous>, transform_indices = @transform_3, window_bounds = array<i64: 8, 32>}, {transform_indices = @transform_4, window_bounds = array<i64: 8, 512>}]} {
    %c0 = arith.constant 0 : index
    %c0_0 = arith.constant 0 : index
    %0 = vector.load %arg1[%c0, %c0_0] : memref<16x512xbf16, #tpu.memory_space<vmem>>, vector<16x512xbf16>
    %c0_1 = arith.constant 0 : index
    %c0_2 = arith.constant 0 : index
    %1 = vector.load %arg2[%c0_1, %c0_2] : memref<32x16xbf16, #tpu.memory_space<vmem>>, vector<32x16xbf16>
    %cst = arith.constant dense<0.000000e+00> : vector<32x512xf32>
    %2 = tpu.matmul %1, %0, %cst {dimension_numbers = #tpu.dot_dimension_numbers<[1], [0], [0], [1], [0, 0, 1, 1], [], []>} : vector<32x16xbf16>, vector<16x512xbf16>, vector<32x512xf32> -> vector<32x512xf32>
    %cst_3 = arith.constant 0.000000e+00 : f32
    %3 = vector.broadcast %cst_3 : f32 to vector<32x512xf32>
    %4 = arith.maximumf %2, %3 : vector<32x512xf32>
    %5 = arith.truncf %4 : vector<32x512xf32> to vector<32x512xbf16>
    %c0_4 = arith.constant 0 : index
    %c0_5 = arith.constant 0 : index
    %6 = vector.load %arg3[%c0_4, %c0_5] : memref<32x32xbf16, #tpu.memory_space<vmem>>, vector<32x32xbf16>
    %cst_6 = arith.constant dense<0.000000e+00> : vector<32x512xf32>
    %7 = tpu.matmul %6, %5, %cst_6 {dimension_numbers = #tpu.dot_dimension_numbers<[1], [0], [0], [1], [0, 0, 1, 1], [], []>} : vector<32x32xbf16>, vector<32x512xbf16>, vector<32x512xf32> -> vector<32x512xf32>
    %cst_7 = arith.constant 0.000000e+00 : f32
    %8 = vector.broadcast %cst_7 : f32 to vector<32x512xf32>
    %9 = arith.maximumf %7, %8 : vector<32x512xf32>
    %10 = arith.truncf %9 : vector<32x512xf32> to vector<32x512xbf16>
    %c0_8 = arith.constant 0 : index
    %c0_9 = arith.constant 0 : index
    %11 = vector.load %arg4[%c0_8, %c0_9] : memref<8x32xbf16, #tpu.memory_space<vmem>>, vector<8x32xbf16>
    %cst_10 = arith.constant dense<0.000000e+00> : vector<8x512xf32>
    %12 = tpu.matmul %11, %10, %cst_10 {dimension_numbers = #tpu.dot_dimension_numbers<[1], [0], [0], [1], [0, 0, 1, 1], [], []>} : vector<8x32xbf16>, vector<32x512xbf16>, vector<8x512xf32> -> vector<8x512xf32>
    %c0_11 = arith.constant 0 : index
    %c0_12 = arith.constant 0 : index
    %13 = vector.load %arg5[%c0_11, %c0_12] : memref<8x512xf32, #tpu.memory_space<vmem>>, vector<8x512xf32>
    tpu.vector_store %arg5[%c0_11, %c0_12], %12 {strides = array<i32>} : memref<8x512xf32, #tpu.memory_space<vmem>>, vector<8x512xf32>,
    return
  }
  func.func @transform_0(%arg0: i32) -> (i32, i32) {
    %c0_i32 = arith.constant 0 : i32
    %c0_i32_0 = arith.constant 0 : i32
    return %c0_i32, %arg0 : i32, i32
  }
  func.func @transform_1(%arg0: i32) -> (i32, i32) {
    %c0_i32 = arith.constant 0 : i32
    %c0_i32_0 = arith.constant 0 : i32
    %c0_i32_1 = arith.constant 0 : i32
    return %c0_i32, %c0_i32_0 : i32, i32
  }
  func.func @transform_2(%arg0: i32) -> (i32, i32) {
    %c0_i32 = arith.constant 0 : i32
    %c0_i32_0 = arith.constant 0 : i32
    %c0_i32_1 = arith.constant 0 : i32
    return %c0_i32, %c0_i32_0 : i32, i32
  }
  func.func @transform_3(%arg0: i32) -> (i32, i32) {
    %c0_i32 = arith.constant 0 : i32
    %c0_i32_0 = arith.constant 0 : i32
    %c0_i32_1 = arith.constant 0 : i32
    return %c0_i32, %c0_i32_0 : i32, i32
  }
  func.func @transform_4(%arg0: i32) -> (i32, i32) {
    %c0_i32 = arith.constant 0 : i32
    %c0_i32_0 = arith.constant 0 : i32
    return %c0_i32, %arg0 : i32, i32
  }
}

</mosaic_0001>

<bundles_post_ra>
// kernel: mlp_forward.1
= control target key start
LH: loop header
LB: loop body
LE: loop exit
PB: predicated region body
PF: predicated region fallthrough
CT: control target
= control target key end

     0   :  { %s822_s15 = smov 0   ;;  %s824_s16 = smov 0   ;;  %s905_s0 = inlined_call_operand.vmem [shape: bf16[16,1024], index: 0, kind: input, shape index: {}]   ;;  %s906_s1 = inlined_call_operand.vmem [shape: bf16[32,16], index: 1, kind: input, shape index: {}]   ;;  %s907_s2 = inlined_call_operand.vmem [shape: bf16[32,32], index: 2, kind: input, shape index: {}]   ;;  %s908_s3 = inlined_call_operand.vmem [shape: bf16[8,32], index: 3, kind: input, shape index: {}]   ;;  %s909_s4 = inlined_call_operand.vmem [shape: f32[8,1024], index: 4, kind: output, shape index: {}]  }
   0x1   :  { %s826_s17 = smov 0  }
   0x2 LB: > { %s705_s18 = sadd.s32 4294967295, %s794_s17   ;;  %s839_s19 = sadd.s32 1, %s794_s17   ;;  %s794_s17 = sphi %s826_s17, %s912_s17   ;;  %s790_s16 = sphi %s824_s16, %s911_s16   ;;  %s786_s15 = sphi %s822_s15, %s910_s15  }
   0x3   : > { %s18_s20 = ssub.s32 %s794_s17, %s839_s19  ;;  %s21_s21 = sadd.s32 1, %s790_s16 }
   0x4   : > { %p19_p0 = scmp.eq.s32.totalorder %s18_s20, 0  ;;  %p28_p1 = scmp.ne.s32.totalorder %s790_s16, %s786_s15 }
   0x5   : > { %p29_p2 = scmp.eq.s32.totalorder %s794_s17, 0  ;;  %p708_p4 = scmp.ge.s32.totalorder %s794_s17, 2 }
   0x6   : > { %s848_s22 = scalar_select %p19_p0, %s790_s16, %s21_s21  }
   0x7   : > { %p30_p3 = por %p29_p2, %p28_p1  ;;  %152 = sbr.rel (%p708_p4) target bundleno = 21 (0x15), region = 28 }
   0xe   : > { %155 = sbr.rel (!%p30_p3) target bundleno = 21 (0x15), region = 32  ;;  %s157_s23 = sand.u32 (%p30_p3), 1, %s790_s16  }
   0xf   : > { %s736_s24 = sshll.u32 (%p30_p3), %s794_s17, 4  ;;  %s709_s25 = sshll.u32 (%p30_p3), %s157_s23, 5 }
  0x10   : > { %s162_s28 = scalar_lea.vmem (%p30_p3), %s905_s0, %s736_s24  ;;  %s159_s29 = scalar_lea.vmem (%p30_p3), [#allocation2], %s709_s25 }
  0x11   : > { %v175_v0 = vld [vmem:[%s162_s28] sm:$0xff] (%p30_p3)  ;;  %v177_v1 = vld [vmem:[%s162_s28 + $0x8] sm:$0xff] (%p30_p3) }
  0x12   : > { %v179_v2 = vld [vmem:[%s162_s28 + $0x20] sm:$0xff] (%p30_p3)  ;;  %176 = vst [vmem:[%s159_s29] sm:$0xff] (%p30_p3), %v175_v0  ;;  %178 = vst [vmem:[%s159_s29 + $0x8] sm:$0xff] (%p30_p3), %v177_v1  ;;  %v181_v3 = vld [vmem:[%s162_s28 + $0x28] sm:$0xff] (%p30_p3) }
  0x13   : > { %180 = vst [vmem:[%s159_s29 + $0x10] sm:$0xff] (%p30_p3), %v179_v2  ;;  %182 = vst [vmem:[%s159_s29 + $0x18] sm:$0xff] (%p30_p3), %v181_v3 }
  0x15 PF: > { %p712_p5 = scmp.ge.s32.totalorder %s794_s17, 1  ;;  %p187_p6 = scmp.lt.s32.totalorder %s794_s17, 3 }
  0x17   : > { %p188_p7 = pnand %p712_p5, %p187_p6 }
  0x18   : > { %s194_s30 = sand.u32 (!%p188_p7), 1, %s786_s15   ;;  %v796_v4 = vmov (!%p188_p7), 0   ;;  %v768_v9 = vld [vmem:[%s906_s1] sm:$0xff] (!%p188_p7)   ;;  %vm265_vm0 = vcmask (!%p188_p7), 130048   ;;  %v769_v10 = vld [vmem:[%s906_s1 + $0x8] sm:$0xff] (!%p188_p7)   ;;  %vm416_vm1 = vcmask (!%p188_p7), 261120  }
  0x19   : > { %191 = sbr.rel (%p188_p7) target bundleno = 709 (0x2c5), region = 55  ;;  %s713_s5 = sshll.u32 (!%p188_p7), %s194_s30, 5  ;;  %304 = vmatprep.mubr.bf16.mxu0 (!%p188_p7), %v796_v4  ;;  %357 = vmatprep.mubr.bf16.mxu1 (!%p188_p7), %v796_v4  ;;  %v770_v51 = vld [vmem:[%s907_s2] sm:$0xff] (!%p188_p7)   ;;  %v771_v52 = vld [vmem:[%s907_s2 + $0x8] sm:$0xff] (!%p188_p7)  }
  0x1a   : > { %s196_s6 = scalar_lea.vmem (!%p188_p7), [#allocation2], %s713_s5  ;;  %s714_s21 = sshll.u32 (!%p188_p7), %s705_s18, 2 }
  0x1b   : > { %v762_v5 = vld [vmem:[%s196_s6 + $0x4] ss:$16 sps:$4 sm:$0xff] (!%p188_p7)   ;;  %v764_v6 = vld [vmem:[%s196_s6 + $0xc] ss:$16 sps:$4 sm:$0xff] (!%p188_p7)   ;;  %v766_v7 = vld [vmem:[%s196_s6] ss:$16 sps:$4 sm:$0xff] (!%p188_p7)  }
  0x1c   : > { %272 = vmatprep.subr.bf16.mxu0 (!%p188_p7), %v762_v5  ;;  %v767_v8 = vld [vmem:[%s196_s6 + $0x8] ss:$16 sps:$4 sm:$0xff] (!%p188_p7)   ;;  %325 = vmatprep.subr.bf16.mxu1 (!%p188_p7), %v764_v6  ;;  %p221_p8 = scmp.lt.s32.totalorder (!%p188_p7), %s714_s21, 7 }
  0x1d   : > { %273 = vmatpush1.bf16.msra.mxu0 (!%p188_p7), %v766_v7  ;;  %326 = vmatpush1.bf16.msra.mxu1 (!%p188_p7), %v767_v8 }
  0x20   : > { %722 = vmatmul.mubr.msk.bf16.vlgmr.msra.gmra.mrb[0].mxu0 %vm265_vm0, %v768_v9  ;;  %724 = vmatmul.mubr.msk.bf16.vlgmr.msra.gmra.mrb[0].mxu1 %vm265_vm0, %v768_v9  ;;  %s914_s21 = smov (!%p221_p8, %s714_s21), 7 }
  0x21   : > { %314 = vmatprep.mubr.bf16.mxu0 %v796_v4  ;;  %367 = vmatprep.mubr.bf16.mxu1 %v796_v4  ;;  %s715_s23 = sshll.u32 %s914_s21, 3 }
  0x22   : > { %s224_s26 = scalar_lea.vmem %s909_s4, %s715_s23 }
  0x28   : > { %723 = vmatmul.mubr.msk.bf16.gmra.mrb[4].mxu0 %vm265_vm0, %v769_v10  ;;  %725 = vmatmul.mubr.msk.bf16.gmra.mrb[4].mxu1 %vm265_vm0, %v769_v10 }
  0x29   : > { %455 = vmatprep.mubr.bf16.mxu0 %v796_v4  ;;  %508 = vmatprep.mubr.bf16.mxu1 %v796_v4 }
  0xf3   : > { %v306_v11 = vpop.f32.mrb[0].mxu0  ;;  %v359_v12 = vpop.f32.mrb[0].mxu1 }
  0xf4   : > { %v380_v13 = vmax.f32 %v359_v12, 0.0  ;;  %v308_v14 = vpop.f32.mrb[1].mxu0  ;;  %v361_v15 = vpop.f32.mrb[1].mxu1  ;;  %v378_v18 = vmax.f32 %v306_v11, 0.0 }
  0xf5   : > { %v310_v16 = vpop.f32.mrb[2].mxu0  ;;  %v363_v17 = vpop.f32.mrb[2].mxu1  ;;  %v379_v23 = vmax.f32 %v308_v14, 0.0  ;;  %v381_v24 = vmax.f32 %v361_v15, 0.0 }
  0xf6   : > { %v382_v19 = vmax.f32 %v310_v16, 0.0  ;;  %v384_v20 = vmax.f32 %v363_v17, 0.0  ;;  %v312_v21 = vpop.f32.mrb[3].mxu0  ;;  %v365_v22 = vpop.f32.mrb[3].mxu1 }
  0xf7   : > { %v383_v25 = vmax.f32 %v312_v21, 0.0  ;;  %v385_v26 = vmax.f32 %v365_v22, 0.0 }
  0xf8   : > { %v394_v27 = vpack.c.bf16 %v382_v19, %v378_v18  ;;  %v396_v28 = vpack.c.bf16 %v384_v20, %v380_v13 }
  0xf9   : > { %v395_v29 = vpack.c.bf16 %v383_v25, %v379_v23  ;;  %v397_v30 = vpack.c.bf16 %v385_v26, %v381_v24 }
  0xfb   : > { %v316_v31 = vpop.f32.mrb[4].mxu0  ;;  %v369_v32 = vpop.f32.mrb[4].mxu1  ;;  %423 = vmatprep.subr.bf16.mxu0 %v395_v29  ;;  %476 = vmatprep.subr.bf16.mxu1 %v397_v30  ;;  %v553_v29 = vld [vmem:[%s908_s3] sm:$0xf] }
  0xfc   : > { %v388_v33 = vmax.f32 %v369_v32, 0.0  ;;  %v318_v34 = vpop.f32.mrb[5].mxu0  ;;  %v371_v35 = vpop.f32.mrb[5].mxu1  ;;  %424 = vmatpush1.bf16.msra.mxu0 %v394_v27  ;;  %477 = vmatpush1.bf16.msra.mxu1 %v396_v28  ;;  %v386_v38 = vmax.f32 %v316_v31, 0.0 }
  0xfd   : > { %v320_v36 = vpop.f32.mrb[6].mxu0  ;;  %v373_v37 = vpop.f32.mrb[6].mxu1  ;;  %v387_v43 = vmax.f32 %v318_v34, 0.0  ;;  %v389_v44 = vmax.f32 %v371_v35, 0.0 }
  0xfe   : > { %v390_v39 = vmax.f32 %v320_v36, 0.0  ;;  %v392_v40 = vmax.f32 %v373_v37, 0.0  ;;  %v322_v41 = vpop.f32.mrb[7].mxu0  ;;  %v375_v42 = vpop.f32.mrb[7].mxu1 }
  0xff   : > { %v391_v45 = vmax.f32 %v322_v41, 0.0  ;;  %v393_v46 = vmax.f32 %v375_v42, 0.0 }
 0x100   : > { %v398_v47 = vpack.c.bf16 %v390_v39, %v386_v38  ;;  %v400_v48 = vpack.c.bf16 %v392_v40, %v388_v33 }
 0x101   : > { %v399_v49 = vpack.c.bf16 %v391_v45, %v387_v43  ;;  %v401_v50 = vpack.c.bf16 %v393_v46, %v389_v44 }
 0x103   : > { %425 = vmatprep.subr.bf16.mxu0 %v399_v49  ;;  %478 = vmatprep.subr.bf16.mxu1 %v401_v50 }
 0x104   : > { %426 = vmatpush1.bf16.msra.mxu0 %v398_v47  ;;  %479 = vmatpush1.bf16.msra.mxu1 %v400_v48 }
 0x107   : > { %728 = vmatmul.mubr.msk.bf16.vlgmr.msra.gmra.mrb[8].mxu0 %vm416_vm1, %v770_v51  ;;  %730 = vmatmul.mubr.msk.bf16.vlgmr.msra.gmra.mrb[8].mxu1 %vm416_vm1, %v770_v51 }
 0x108   : > { %465 = vmatprep.mubr.bf16.mxu0 %v796_v4  ;;  %518 = vmatprep.mubr.bf16.mxu1 %v796_v4 }
 0x10f   : > { %729 = vmatmul.mubr.msk.bf16.gmra.mrb[12].mxu0 %vm416_vm1, %v771_v52  ;;  %731 = vmatmul.mubr.msk.bf16.gmra.mrb[12].mxu1 %vm416_vm1, %v771_v52 }
 0x110   : > { %589 = vmatprep.mubr.bf16.mxu0 %v796_v4  ;;  %630 = vmatprep.mubr.bf16.mxu1 %v796_v4 }
 0x1da   : > { %v457_v53 = vpop.f32.mrb[8].mxu0  ;;  %v510_v54 = vpop.f32.mrb[8].mxu1 }
 0x1db   : > { %v531_v55 = vmax.f32 %v510_v54, 0.0  ;;  %v459_v56 = vpop.f32.mrb[9].mxu0  ;;  %v512_v57 = vpop.f32.mrb[9].mxu1  ;;  %v529_v60 = vmax.f32 %v457_v53, 0.0 }
 0x1dc   : > { %v461_v58 = vpop.f32.mrb[10].mxu0  ;;  %v514_v59 = vpop.f32.mrb[10].mxu1  ;;  %v530_v1 = vmax.f32 %v459_v56, 0.0  ;;  %v532_v2 = vmax.f32 %v512_v57, 0.0 }
 0x1dd   : > { %v533_v61 = vmax.f32 %v461_v58, 0.0  ;;  %v535_v62 = vmax.f32 %v514_v59, 0.0  ;;  %v463_v63 = vpop.f32.mrb[11].mxu0  ;;  %v516_v0 = vpop.f32.mrb[11].mxu1 }
 0x1de   : > { %v534_v3 = vmax.f32 %v463_v63, 0.0  ;;  %v536_v5 = vmax.f32 %v516_v0, 0.0 }
 0x1df   : > { %v545_v6 = vpack.c.bf16 %v533_v61, %v529_v60  ;;  %v547_v7 = vpack.c.bf16 %v535_v62, %v531_v55 }
 0x1e0   : > { %v546_v8 = vpack.c.bf16 %v534_v3, %v530_v1  ;;  %v548_v4 = vpack.c.bf16 %v536_v5, %v532_v2 }
 0x1e2   : > { %v467_v9 = vpop.f32.mrb[12].mxu0  ;;  %v520_v10 = vpop.f32.mrb[12].mxu1  ;;  %557 = vmatprep.subr.bf16.mxu0 %v546_v8  ;;  %598 = vmatprep.subr.bf16.mxu1 %v548_v4 }
 0x1e3   : > { %v539_v11 = vmax.f32 %v520_v10, 0.0  ;;  %v469_v12 = vpop.f32.mrb[13].mxu0  ;;  %v522_v13 = vpop.f32.mrb[13].mxu1  ;;  %558 = vmatpush1.bf16.msra.mxu0 %v545_v6  ;;  %599 = vmatpush1.bf16.msra.mxu1 %v547_v7  ;;  %v537_v16 = vmax.f32 %v467_v9, 0.0 }
 0x1e4   : > { %v471_v14 = vpop.f32.mrb[14].mxu0  ;;  %v524_v15 = vpop.f32.mrb[14].mxu1  ;;  %v538_v21 = vmax.f32 %v469_v12, 0.0  ;;  %v540_v22 = vmax.f32 %v522_v13, 0.0 }
 0x1e5   : > { %v541_v17 = vmax.f32 %v471_v14, 0.0  ;;  %v543_v18 = vmax.f32 %v524_v15, 0.0  ;;  %v473_v19 = vpop.f32.mrb[15].mxu0  ;;  %v526_v20 = vpop.f32.mrb[15].mxu1 }
 0x1e6   : > { %v542_v23 = vmax.f32 %v473_v19, 0.0  ;;  %v544_v24 = vmax.f32 %v526_v20, 0.0 }
 0x1e7   : > { %v549_v25 = vpack.c.bf16 %v541_v17, %v537_v16  ;;  %v551_v26 = vpack.c.bf16 %v543_v18, %v539_v11 }
 0x1e8   : > { %v550_v27 = vpack.c.bf16 %v542_v23, %v538_v21  ;;  %v552_v28 = vpack.c.bf16 %v544_v24, %v540_v22 }
 0x1ea   : > { %559 = vmatprep.subr.bf16.mxu0 %v550_v27  ;;  %600 = vmatprep.subr.bf16.mxu1 %v552_v28 }
 0x1eb   : > { %560 = vmatpush1.bf16.msra.mxu0 %v549_v25  ;;  %601 = vmatpush1.bf16.msra.mxu1 %v551_v26 }
 0x1ee   : > { %732 = vmatmul.mubr.msk.bf16.vlgmr.msra.gmra.mrb[16].mxu0 %vm416_vm1, %v553_v29  ;;  %733 = vmatmul.mubr.msk.bf16.vlgmr.msra.gmra.mrb[16].mxu1 %vm416_vm1, %v553_v29 }
 0x2c1   : > { %v591_v30 = vpop.f32.mrb[16].mxu0  ;;  %v632_v31 = vpop.f32.mrb[16].mxu1 }
 0x2c2   : > { %639 = vst [vmem:[%s224_s26] sm:$0xff] %v591_v30  ;;  %v593_v32 = vpop.f32.mrb[17].mxu0  ;;  %v634_v33 = vpop.f32.mrb[17].mxu1  ;;  %641 = vst [vmem:[%s224_s26 + $0x10] sm:$0xff] %v632_v31 }
 0x2c3   : > { %640 = vst [vmem:[%s224_s26 + $0x8] sm:$0xff] %v593_v32  ;;  %v595_v34 = vpop.f32.mrb[18].mxu0  ;;  %v636_v35 = vpop.f32.mrb[18].mxu1  ;;  %642 = vst [vmem:[%s224_s26 + $0x18] sm:$0xff] %v634_v33 }
 0x2c4   : > { %v596_v36 = vpop.f32.mrb[19].mxu0  ;;  %v637_v37 = vpop.f32.mrb[19].mxu1 }
 0x2c5 PF: > { %p11_p9 = scmp.ge.s32.totalorder %s839_s19, 4   ;;  %s910_s15 = smov %s790_s16 }
 0x2c6   : > { %s911_s16 = smov %s848_s22  ;;  %s912_s17 = smov %s839_s19 }
 0x2c7   :  { %13 = sbr.rel (!%p11_p9) target bundleno = 2 (0x2), region = 94 }

</bundles_post_ra>
